<compile_context>
chip_gen: v7x
topology: tpu7x:2x2x1
jax: 0.10.0
libtpu: 0.0.40
codegen_flags: <defaults>
</compile_context>

<pallas_src>
import jax
import jax.numpy as jnp
from jax.experimental import pallas as pl
from jax.experimental.pallas import tpu as pltpu

IN_F, H1, H2, OUT_F = 84, 32, 8, 1


def mlp_kernel(x_ref, w1a_ref, w2a_ref, w3a_ref, o_ref):
    """x_ref: (TILE_B, 84) bf16; w*a_ref: packed [W^T | b] slabs; o_ref: (1, TILE_B) f32."""
    x = x_ref[...]                                              # (TILE_B, 84) bf16

    # Layer 1: contract over the 84 input features. x stays in its natural (batch, feat) layout;
    # the transpose is folded into the dot_general "NT" form (same pattern as q @ k^T in flash attn).
    w1t = w1a_ref[:, :IN_F]                                     # (32, 84) bf16
    b1 = w1a_ref[:, IN_F:IN_F + 1].astype(jnp.float32)          # (32, 1)
    z1 = jax.lax.dot_general(w1t, x, (((1,), (1,)), ((), ())),
                             preferred_element_type=jnp.float32)  # (32, TILE_B) f32
    h1 = jnp.tanh(z1 + b1)                                      # (32, TILE_B) f32

    # Layer 2 (tiny; keep the math in f32).
    w2t = w2a_ref[:, :H1].astype(jnp.float32)                   # (8, 32)
    b2 = w2a_ref[:, H1:H1 + 1].astype(jnp.float32)              # (8, 1)
    h2 = jnp.tanh(jnp.dot(w2t, h1, preferred_element_type=jnp.float32) + b2)  # (8, TILE_B)

    # Layer 3: single output unit -> broadcast-multiply + sublane reduce keeps the result
    # lane-dense with no transpose and no MXU call.
    w3 = w3a_ref[:H2, :].astype(jnp.float32)                    # (8, 1)
    b3 = w3a_ref[H2:H2 + 1, :].astype(jnp.float32)              # (1, 1)
    z3 = jnp.sum(h2 * w3, axis=0, keepdims=True) + b3           # (1, TILE_B)
    o_ref[...] = jnp.tanh(z3).astype(o_ref.dtype)


def _round_up(n: int, m: int) -> int:
    return ((n + m - 1) // m) * m


def init_params(key):
    """Deterministic init matching nn.Linear default: U(-1/sqrt(fan_in), 1/sqrt(fan_in))."""
    dims = [(IN_F, H1), (H1, H2), (H2, OUT_F)]
    params = []
    for (fan_in, fan_out) in dims:
        key, kw, kb = jax.random.split(key, 3)
        bound = 1.0 / jnp.sqrt(jnp.float32(fan_in))
        w = jax.random.uniform(kw, (fan_in, fan_out), jnp.float32, -bound, bound)
        b = jax.random.uniform(kb, (1, fan_out), jnp.float32, -bound, bound)
        params += [w, b]
    return tuple(params)


def pack_params(params):
    """Fold each bias into its transposed weight and cast to bf16: 3 slabs instead of 6 arrays."""
    w1, b1, w2, b2, w3, b3 = params
    w1a = jnp.concatenate([w1.T, b1.reshape(-1, 1)], axis=1).astype(jnp.bfloat16)          # (32, 85)
    w2a = jnp.concatenate([w2.T, b2.reshape(-1, 1)], axis=1).astype(jnp.bfloat16)          # (8, 33)
    w3a = jnp.concatenate([w3.reshape(-1, 1), b3.reshape(1, 1)], axis=0).astype(jnp.bfloat16)  # (9, 1)
    return w1a, w2a, w3a


def mnist_nn_forward(x, packed_params, tile_b: int = 2048):
    """x: (B, 84) float -> (B, 1) float32, matching Mnist_NN.forward."""
    w1a, w2a, w3a = packed_params
    B, f = x.shape
    assert f == IN_F

    if B <= tile_b:
        tile = _round_up(B, 16)            # single tile: block == (padded) array, always legal
    else:
        tile = _round_up(tile_b, 128)      # lane-dense output block must be a multiple of 128
    b_pad = _round_up(B, tile)
    num_tiles = b_pad // tile

    xb = x.astype(jnp.bfloat16)
    if b_pad != B:                          # pad only when needed; common case stays copy-free
        xb = jnp.pad(xb, ((0, b_pad - B), (0, 0)))

    out = pl.pallas_call(
        mlp_kernel,
        out_shape=jax.ShapeDtypeStruct((1, b_pad), jnp.float32),
        grid=(num_tiles,),
        in_specs=[
            pl.BlockSpec((tile, IN_F), lambda i: (i, 0)),    # batch-tiled activation stream
            pl.BlockSpec(w1a.shape, lambda i: (0, 0)),       # params: constant block idx -> fetched once
            pl.BlockSpec(w2a.shape, lambda i: (0, 0)),
            pl.BlockSpec(w3a.shape, lambda i: (0, 0)),
        ],
        out_specs=pl.BlockSpec((1, tile), lambda i: (0, i)),  # lane-dense output (batch on lanes)
        compiler_params=pltpu.CompilerParams(
            dimension_semantics=("parallel",)),               # shard batch tiles across v7x's 2 TCs
    )(xb, w1a, w2a, w3a)

    # Back to the torch-facing (B, 1) layout (x.view(-1, 1)); this touches only B*4 bytes.
    return out[0, :B].reshape(-1, 1)


def reference_forward(x, params, compute_dtype=jnp.float32):
    """Pure-JAX reference. compute_dtype=bf16 mirrors the kernel's input rounding (math stays f32)."""
    w1, b1, w2, b2, w3, b3 = params
    r = lambda a: a.astype(compute_dtype).astype(jnp.float32)
    h = jnp.tanh(r(x) @ r(w1) + r(b1))
    h = jnp.tanh(h @ r(w2) + r(b2))
    h = jnp.tanh(h @ r(w3) + r(b3))
    return h.reshape(-1, 1)


if __name__ == "__main__":
    key = jax.random.PRNGKey(0)
    key, kx, kx2 = jax.random.split(key, 3)

    params = init_params(key)
    packed = pack_params(params)

    # Small batch (single-tile path).
    B = 8
    x = jax.random.normal(kx, (B, IN_F), jnp.float32)
    y = jax.block_until_ready(mnist_nn_forward(x, packed))
    assert y.shape == (B, 1)
    assert jnp.allclose(y, reference_forward(x, params, jnp.bfloat16), atol=2e-3, rtol=2e-3)
    assert jnp.allclose(y, reference_forward(x, params, jnp.float32), atol=5e-2, rtol=5e-2)

    # Ragged batch exercising the multi-tile grid + padding path.
    B2 = 300
    x2 = jax.random.normal(kx2, (B2, IN_F), jnp.float32)
    y2 = jax.block_until_ready(mnist_nn_forward(x2, packed, tile_b=128))
    assert y2.shape == (B2, 1)
    assert jnp.allclose(y2, reference_forward(x2, params, jnp.bfloat16), atol=2e-3, rtol=2e-3)

    print("KERNEL_OK")
</pallas_src>

<mosaic_0001>
module attributes {stable_mosaic.version = 11 : i64} {
  func.func @mlp_kernel(%arg0: i32, %arg1: memref<16x84xbf16, #tpu.memory_space<vmem>>, %arg2: memref<32x85xbf16, #tpu.memory_space<vmem>>, %arg3: memref<8x33xbf16, #tpu.memory_space<vmem>>, %arg4: memref<9x1xbf16, #tpu.memory_space<vmem>>, %arg5: memref<1x16xf32, #tpu.memory_space<vmem>>) attributes {dimension_semantics = [#tpu.dimension_semantics<parallel>], iteration_bounds = array<i64: 1>, scalar_prefetch = 0 : i64, scratch_operands = 0 : i64, tpu.core_type = #tpu.core_type<tc>, window_params = [{transform_indices = @transform_0, window_bounds = array<i64: 16, 84>}, {pipeline_mode = #tpu.pipeline_mode<synchronous>, transform_indices = @transform_1, window_bounds = array<i64: 32, 85>}, {pipeline_mode = #tpu.pipeline_mode<synchronous>, transform_indices = @transform_2, window_bounds = array<i64: 8, 33>}, {pipeline_mode = #tpu.pipeline_mode<synchronous>, transform_indices = @transform_3, window_bounds = array<i64: 9, 1>}, {transform_indices = @transform_4, window_bounds = array<i64: 1, 16>}]} {
    %c0 = arith.constant 0 : index
    %c0_0 = arith.constant 0 : index
    %0 = vector.load %arg1[%c0, %c0_0] : memref<16x84xbf16, #tpu.memory_space<vmem>>, vector<16x84xbf16>
    %c0_1 = arith.constant 0 : index
    %c0_2 = arith.constant 0 : index
    %1 = vector.load %arg2[%c0_1, %c0_2] : memref<32x85xbf16, #tpu.memory_space<vmem>>, vector<32x84xbf16>
    %c0_3 = arith.constant 0 : index
    %c84 = arith.constant 84 : index
    %2 = vector.load %arg2[%c0_3, %c84] : memref<32x85xbf16, #tpu.memory_space<vmem>>, vector<32x1xbf16>
    %3 = arith.extf %2 : vector<32x1xbf16> to vector<32x1xf32>
    %cst = arith.constant dense<0.000000e+00> : vector<32x16xf32>
    %4 = tpu.matmul %1, %0, %cst {dimension_numbers = #tpu.dot_dimension_numbers<[1], [1], [0], [0], [0, 0, 1, 0], [], []>} : vector<32x84xbf16>, vector<16x84xbf16>, vector<32x16xf32> -> vector<32x16xf32>
    %5 = vector.broadcast %3 : vector<32x1xf32> to vector<32x16xf32>
    %6 = arith.addf %4, %5 : vector<32x16xf32>
    %7 = math.tanh %6 : vector<32x16xf32>
    %c0_4 = arith.constant 0 : index
    %c0_5 = arith.constant 0 : index
    %8 = vector.load %arg3[%c0_4, %c0_5] : memref<8x33xbf16, #tpu.memory_space<vmem>>, vector<8x32xbf16>
    %9 = arith.extf %8 : vector<8x32xbf16> to vector<8x32xf32>
    %c0_6 = arith.constant 0 : index
    %c32 = arith.constant 32 : index
    %10 = vector.load %arg3[%c0_6, %c32] : memref<8x33xbf16, #tpu.memory_space<vmem>>, vector<8x1xbf16>
    %11 = arith.extf %10 : vector<8x1xbf16> to vector<8x1xf32>
    %cst_7 = arith.constant dense<0.000000e+00> : vector<8x16xf32>
    %12 = tpu.matmul %9, %7, %cst_7 {dimension_numbers = #tpu.dot_dimension_numbers<[1], [0], [0], [1], [0, 0, 1, 1], [], []>} : vector<8x32xf32>, vector<32x16xf32>, vector<8x16xf32> -> vector<8x16xf32>
    %13 = vector.broadcast %11 : vector<8x1xf32> to vector<8x16xf32>
    %14 = arith.addf %12, %13 : vector<8x16xf32>
    %15 = math.tanh %14 : vector<8x16xf32>
    %c0_8 = arith.constant 0 : index
    %c0_9 = arith.constant 0 : index
    %16 = vector.load %arg4[%c0_8, %c0_9] : memref<9x1xbf16, #tpu.memory_space<vmem>>, vector<8x1xbf16>
    %17 = arith.extf %16 : vector<8x1xbf16> to vector<8x1xf32>
    %c8 = arith.constant 8 : index
    %c0_10 = arith.constant 0 : index
    %18 = vector.load %arg4[%c8, %c0_10] : memref<9x1xbf16, #tpu.memory_space<vmem>>, vector<1x1xbf16>
    %19 = arith.extf %18 : vector<1x1xbf16> to vector<1x1xf32>
    %20 = vector.broadcast %17 : vector<8x1xf32> to vector<8x16xf32>
    %21 = arith.mulf %15, %20 : vector<8x16xf32>
    %cst_11 = arith.constant dense<0.000000e+00> : vector<16xf32>
    %22 = vector.multi_reduction <add>, %21, %cst_11 [0] : vector<8x16xf32> to vector<16xf32>
    %23 = vector.shape_cast %22 : vector<16xf32> to vector<1x16xf32>
    %24 = vector.broadcast %19 : vector<1x1xf32> to vector<1x16xf32>
    %25 = arith.addf %23, %24 : vector<1x16xf32>
    %26 = math.tanh %25 : vector<1x16xf32>
    %c0_12 = arith.constant 0 : index
    %c0_13 = arith.constant 0 : index
    %27 = vector.load %arg5[%c0_12, %c0_13] : memref<1x16xf32, #tpu.memory_space<vmem>>, vector<1x16xf32>
    tpu.vector_store %arg5[%c0_12, %c0_13], %26 {strides = array<i32>} : memref<1x16xf32, #tpu.memory_space<vmem>>, vector<1x16xf32>,
    return
  }
  func.func @transform_0(%arg0: i32) -> (i32, i32) {
    %c0_i32 = arith.constant 0 : i32
    %c0_i32_0 = arith.constant 0 : i32
    return %arg0, %c0_i32 : i32, i32
  }
  func.func @transform_1(%arg0: i32) -> (i32, i32) {
    %c0_i32 = arith.constant 0 : i32
    %c0_i32_0 = arith.constant 0 : i32
    %c0_i32_1 = arith.constant 0 : i32
    return %c0_i32, %c0_i32_0 : i32, i32
  }
  func.func @transform_2(%arg0: i32) -> (i32, i32) {
    %c0_i32 = arith.constant 0 : i32
    %c0_i32_0 = arith.constant 0 : i32
    %c0_i32_1 = arith.constant 0 : i32
    return %c0_i32, %c0_i32_0 : i32, i32
  }
  func.func @transform_3(%arg0: i32) -> (i32, i32) {
    %c0_i32 = arith.constant 0 : i32
    %c0_i32_0 = arith.constant 0 : i32
    %c0_i32_1 = arith.constant 0 : i32
    return %c0_i32, %c0_i32_0 : i32, i32
  }
  func.func @transform_4(%arg0: i32) -> (i32, i32) {
    %c0_i32 = arith.constant 0 : i32
    %c0_i32_0 = arith.constant 0 : i32
    return %c0_i32, %arg0 : i32, i32
  }
}

</mosaic_0001>

<bundles_post_ra>
// kernel: tpu_custom_call.1
= control target key start
LH: loop header
LB: loop body
LE: loop exit
PB: predicated region body
PF: predicated region fallthrough
CT: control target
= control target key end

     0   :  { %9 = vsyncpa [#allocation3], 0  ;;  %s466_s0 = inlined_call_operand.vmem [shape: bf16[16,84], index: 0, kind: input, shape index: {}]   ;;  %s467_s1 = inlined_call_operand.hbm [shape: bf16[32,85], index: 1, kind: input, shape index: {}]   ;;  %s468_s2 = inlined_call_operand.vmem [shape: bf16[8,33], index: 2, kind: input, shape index: {}]   ;;  %s469_s3 = inlined_call_operand.vmem [shape: bf16[9,1], index: 3, kind: input, shape index: {}]   ;;  %s470_s4 = inlined_call_operand.hbm [shape: f32[1,16], index: 4, kind: output, shape index: {}]  }
   0x1   :  { %10 = vsyncpa [#allocation4], 0  ;;  %s395_s15 = smov [#allocation2]   ;;  %s347_s19 = scalar_lea.hbm %s467_s1, 256 }
   0x2   :  { %s18_s16 = sshll.u32 %s395_s15, 4  ;;  %p348_p0 = scmp.ne.s32.totalorder %s467_s1, %s347_s19  ;;  %s19_s16 = int_to_ptr.vmem [resolvable:$true] %s18_s16 }
   0x3   :  { %p351_p1 = scmp.lt.u32.totalorder %s347_s19, %s467_s1 }
   0x5   :  { %p353_p2 = pnand %p351_p1, %p348_p0 }
   0x7   :  { %356 = shalt.err (!%p353_p2)
}
   0x8   :  { %s357_s24 = scalar_lea.vmem %s19_s16, 256  ;;  %p362_p4 = scmp.lt.s32.totalorder %s19_s16, %s19_s16 }
   0x9   :  { %p358_p3 = scmp.ne.s32.totalorder %s19_s16, %s357_s24  ;;  %p363_p5 = scmp.lt.s32.totalorder %s357_s24, %s357_s24 }
   0xb   :  { %p364_p6 = por %p363_p5, %p362_p4 }
   0xd   :  { %p365_p7 = pnand %p364_p6, %p358_p3 }
   0xf   :  { %368 = shalt.err (!%p365_p7)
}
  0x10   :  { %s396_s25 = smov 64   ;;  %s397_s26 = smov 4  }
  0x11   :  { %24 = dma.hbm_to_vmem [thread:$0]  %s467_s1, 256, %s19_s16, [#allocation3], %s396_s25, %s396_s25, %s397_s26  }
  0x12   :  { %391 = dma.done.wait [#allocation3], 256  }
  0x13   :  { %392 = vsyncadd [#allocation3], 4294967040  ;;  %v398_v0 = vmov 84   ;;  %vm78_vm0 = vcmask 687104   ;;  %v326_v1 = vld [vmem:[%s466_s0] sm:$0xff]   ;;  %v37_v4 = vld [vmem:[#allocation2 + $0x8] sm:$0xff]  }
  0x14   :  { %312 = vset.pattern.permute.xlu0 %v398_v0  ;;  %v35_v2 = vld [vmem:[#allocation2] sm:$0xff]   ;;  %301 = vmatprep.subr.msk.bf16.mxu0 %vm78_vm0, %v326_v1  ;;  %v86_v3 = vsel %vm78_vm0, %v326_v1, 0  ;;  %v41_v7 = vunpack.c.l.bf16 %v37_v4  ;;  %v42_v8 = vunpack.c.h.bf16 %v37_v4  ;;  %v399_v11 = vmov 0.0|0.0  }
  0x15   :  { %v39_v5 = vunpack.c.l.bf16 %v35_v2  ;;  %279 = vmatpush3.bf16.xpose.msra.mxu0 %v86_v3  ;;  %v40_v6 = vunpack.c.h.bf16 %v35_v2  ;;  %280 = vmatprep.mubr.msk.bf16.mxu0 %vm78_vm0, %v35_v2  ;;  %v141_v12 = vld [vmem:[%s468_s2] sm:$0xf]  ;;  %vm400_vm1 = vmmov 0   ;;  %v401_v13 = vmov 0.0   ;;  %v224_v16 = vld [vmem:[%s469_s3 + $0x4] sm:$0x1] }
  0x16   :  { %v318_v10 = vpack.i.bf16 %v42_v8, %v41_v7  ;;  %295 = vmatprep.subr.bf16.mxu1 %v399_v11  ;;  %292 = vmatprep.mubr.msk.f32.mxu1 %vm400_vm1, %v401_v13  ;;  %v142_v14 = vunpack.c.l.bf16 %v141_v12  ;;  %v222_v15 = vld [vmem:[%s469_s3] sm:$0xf]  ;;  %v402_v17 = vmov 32   ;;  %v403_v18 = vmov 0   ;;  %s404_s2 = smov [#allocation5]  }
  0x17   :  { %v313_v9 = vpack.i.bf16 %v40_v6, %v39_v5  ;;  %323 = vset.pattern.permute.xlu1 %v402_v17  ;;  %v225_v19 = vunpack.c.l.bf16 %v224_v16  ;;  %v223_v20 = vunpack.c.l.bf16 %v222_v15  ;;  %vm148_vm2 = vcmask 261120   ;;  %s255_s3 = sshll.u32 %s404_s2, 4  ;;  %s256_s3 = int_to_ptr.vmem [resolvable:$true] %s255_s3 }
  0x18   :  { %145 = vperm.xlu1 %323, %v142_v14   ;;  %vm232_vm3 = vcmask 130048   ;;  %vm247_vm4 = vcmask 122880   ;;  %s369_s9 = scalar_lea.vmem %s256_s3, 16  ;;  %s373_s10 = scalar_lea.vmem %s256_s3, 32 }
  0x19   :  { %314 = vperm.xlu0 %312, %v313_v9   ;;  %p370_p8 = scmp.ne.s32.totalorder %s256_s3, %s369_s9  ;;  %p374_p9 = scmp.lt.s32.totalorder %s256_s3, %s256_s3 }
  0x1a   :  { %p375_p10 = scmp.lt.s32.totalorder %s373_s10, %s369_s9 }
  0x1c   :  { %281 = vmatmul.mubr.msk.bf16.vlgmr.msra.gmra.mrb[0].mxu0 %vm78_vm0, %v37_v4  ;;  %324 = vset.pattern.permute.xlu1 %v403_v18  ;;  %p376_p11 = por %p375_p10, %p374_p9 }
  0x1d   :  { %319 = vperm.xlu0 %312, %v318_v10   ;;  %228 = vperm.xlu1 %324, %v223_v20  }
  0x1e   :  { %p377_p12 = pnand %p376_p11, %p370_p8 }
  0x21   :  { %325 = vset.pattern.permute.xlu0 %v403_v18 }
  0x22   :  { %242 = vperm.xlu0 %325, %v225_v19  }
  0x97   :  { %v146_v37 = vpop.permute.xlu1 %145 }
  0x98   :  { %v315_v21 = vpop.permute.xlu0 %314 }
  0x9c   :  { %v320_v22 = vpop.permute.xlu0 %319  ;;  %v229_v41 = vpop.permute.xlu1 %228 }
  0xa1   :  { %v243_v50 = vpop.permute.xlu0 %242 }
  0xef   :  { %v282_v23 = vpop.f32.mrb[0].mxu0 }
  0xf0   :  { %v343_v24 = vadd.low.f32.bf16 %v282_v23, %v320_v22  ;;  %v122_v25 = vpop.f32.mrb[1].mxu0 }
  0xf1   :  { %v344_v26 = vadd.low.f32.bf16 %v122_v25, %v315_v21  ;;  %v283_v27 = vpop.f32.mrb[2].mxu0 }
  0xf2   :  { %331 = vtanh.f32 %v343_v24  ;;  %v345_v28 = vadd.high.f32.bf16 %v283_v27, %v320_v22  ;;  %v125_v29 = vpop.f32.mrb[3].mxu0 }
  0xf3   :  { %333 = vtanh.f32 %v344_v26  ;;  %v346_v30 = vadd.high.f32.bf16 %v125_v29, %v315_v21 }
  0xf4   :  { %335 = vtanh.f32 %v345_v28 }
  0xf5   :  { %337 = vtanh.f32 %v346_v30 }
  0xfc   :  { %v332_v31 = vpop.eup %331 }
  0xfd   :  { %v334_v32 = vpop.eup %333 }
  0xfe   :  { %v336_v33 = vpop.eup %335 }
  0xff   :  { %v338_v34 = vpop.eup %337  ;;  %v299_v35 = vpack.c.bf16 %v336_v33, %v332_v31 }
 0x100   :  { %v296_v36 = vpack.c.bf16 %v338_v34, %v334_v32 }
 0x102   :  { %297 = vmatpush3.bf16.msra.mxu1 %v296_v36 }
 0x103   :  { %298 = vmatprep.subr.bf16.mxu1 %v399_v11 }
 0x106   :  { %300 = vmatpush3.bf16.msra.mxu1 %v299_v35 }
 0x109   :  { %293 = vmatmul.mubr.msk.f32.vlgmr.msra.gmra.mrb[0].mxu1 %vm148_vm2, %v142_v14 }
 0x1dc   :  { %v217_v38 = vpop.f32.mrb[0].mxu1 }
 0x1dd   :  { %v218_v39 = vadd.f32 %v217_v38, %v146_v37  ;;  %v294_v40 = vpop.f32.mrb[1].mxu1 }
 0x1df   :  { %339 = vtanh.f32 %v218_v39 }
 0x1e9   :  { %v340_v42 = vpop.eup %339 }
 0x1ea   :  { %v231_v43 = vmul.f32 %v340_v42, %v229_v41 }
 0x1ec   :  { %v233_v44 = vsel %vm232_vm3, %v231_v43, 0.0 }
 0x1ed   :  { %v234_v45 = vrot.slane %v233_v44, 4 }
 0x1ef   :  { %v235_v46 = vadd.f32 %v234_v45, %v233_v44 }
 0x1f1   :  { %v236_v47 = vrot.slane %v235_v46, 2 }
 0x1f3   :  { %v237_v48 = vadd.f32 %v236_v47, %v235_v46 }
 0x1f5   :  { %v238_v49 = vrot.slane %v237_v48, 1 }
 0x1f7   :  { %v239_v51 = vadd.f32 %v238_v49, %v237_v48 }
 0x1f9   :  { %v245_v52 = vadd.f32 %v243_v50, %v239_v51 }
 0x1fb   :  { %341 = vtanh.f32 %v245_v52 }
 0x205   :  { %v342_v53 = vpop.eup %341 }
 0x206   :  { %248 = vst.msk [vmem:[#allocation5] sm:$0x1] %vm247_vm4, %v342_v53 }
 0x207   :  { %380 = shalt.err (!%p377_p12)
}
 0x208   :  { %s381_s13 = scalar_lea.hbm %s470_s4, 16 }
 0x209   :  { %p382_p13 = scmp.ne.s32.totalorder %s470_s4, %s381_s13  ;;  %p385_p0 = scmp.lt.u32.totalorder %s381_s13, %s470_s4 }
 0x20b   :  { %p387_p1 = pnand %p385_p0, %p382_p13 }
 0x20d   :  { %390 = shalt.err (!%p387_p1)
}
 0x20e   :  { %258 = dma.vmem_to_hbm [thread:$0]  %s256_s3, 16, %s470_s4, [#allocation4]  }
 0x20f   :  { %393 = dma.done.wait [#allocation4], 16  }
 0x210   :  { %394 = vsyncadd [#allocation4], 4294967280 }
 0x211   :  { %262 = vsyncpa [#allocation3], 1 }
 0x212   :  { %263 = vsyncpa [#allocation4], 1 }

</bundles_post_ra>
